<compile_context>
chip_gen: v5e
topology: v5e:2x2
jax: 0.10.0
libtpu: 0.0.40
codegen_flags: <defaults>
</compile_context>

<pallas_src>
import functools

import jax
import jax.numpy as jnp
from jax import lax
from jax.experimental import pallas as pl
from jax.experimental.pallas import tpu as pltpu


_LANE = 128          # TPU lane width: padded last dims are multiples of this
_SUBLANE = 8         # f32 sublane granularity for block second-minor dims
_NEG_INF = -1e30     # finite "minus infinity" so 0 * pad_logit stays 0.0


def _round_up(x, m):
    return ((x + m - 1) // m) * m


def _vmem_limit_bytes():
    """Per-generation scoped-VMEM limit: ~85% of physical, >=16 MiB headroom."""
    cap = 64 * 1024 * 1024                      # conservative fallback (v7x per-TC)
    try:
        cap = int(pltpu.get_tpu_info().vmem_capacity_bytes)
    except Exception:
        pass
    return max(16 * 1024 * 1024, min(cap - (16 << 20), int(cap * 0.85)))


def _cap_tile_for_vmem(tile, d, h_pad, c_pad, vmem_bytes):
    """Largest row tile whose working set fits comfortably in scoped VMEM.

    Working set: single-buffered weights (Buffered(1)) + double-buffered f32 x
    and target tiles + the (tile, H) / (tile, C) f32 intermediates.
    """
    weights = d * h_pad * 2 + h_pad * 4 + h_pad * c_pad * 2 + c_pad * 4
    out_buf = 2 * _SUBLANE * _LANE * 4
    per_row = (2 * d * 4                      # x tile (f32), double-buffered
               + 2 * 1 * 4                    # target tile, double-buffered
               + h_pad * 4 + h_pad * 2        # h (f32) + bf16 copy for 2nd matmul
               + c_pad * 4)                   # logits slab (f32)
    budget = int(vmem_bytes * 0.7) - weights - out_buf
    if budget < per_row * _SUBLANE:
        return _SUBLANE
    return max(_SUBLANE, min(tile, (budget // per_row) // _SUBLANE * _SUBLANE))


# ----------------------------- fused kernel -------------------------------- #

def _fused_speech_loss_kernel(x_ref, w1_ref, b1_ref, w2_ref, b2_ref, tgt_ref,
                              o_ref):
    """One N-tile: encoder matmul+tanh, decoder matmul, log-softmax NLL partials.

    x_ref   : (TN, D)   f32    flattened feature tile (rows = frames)
    w1_ref  : (D,  Hp)  bf16   encoder weight   (VMEM-resident, single buffer)
    b1_ref  : (1,  Hp)  f32    encoder bias
    w2_ref  : (Hp, Cp)  bf16   decoder weight   (VMEM-resident, single buffer)
    b2_ref  : (1,  Cp)  f32    decoder bias; padded classes hold -1e30
    tgt_ref : (TN, 1)   int32  frame-aligned target class; -1 => masked frame
    o_ref   : (8, 128)  f32    per-tile partials: [0,0]=sum(nll*mask), [0,1]=sum(mask)
    """
    # ---- encoder: h = tanh(x @ W1 + b1); in-kernel bf16 cast (free VPU op),
    # so the features only ever make one f32 pass over HBM.
    x = x_ref[...].astype(jnp.bfloat16)
    h = jnp.dot(x, w1_ref[...], preferred_element_type=jnp.float32)
    h = jnp.tanh(h + b1_ref[...])                                  # (TN, Hp) f32

    # ---- decoder logits: h @ W2 + b2 (padded classes forced to -1e30 via b2)
    logits = jnp.dot(h.astype(jnp.bfloat16), w2_ref[...],
                     preferred_element_type=jnp.float32)
    logits = logits + b2_ref[...]                                  # (TN, Cp) f32

    # ---- log-softmax NLL at the target class (need only lse + gathered logit)
    m = jnp.max(logits, axis=-1, keepdims=True)
    lse = m + jnp.log(jnp.sum(jnp.exp(logits - m), axis=-1, keepdims=True))

    tn, cp = logits.shape
    tgt = tgt_ref[...]                                             # (TN, 1) int32
    mask = (tgt >= 0).astype(jnp.float32)                          # (TN, 1)
    tgt_safe = jnp.maximum(tgt, 0)           # masked rows gather class 0 (finite)
    class_ids = lax.broadcasted_iota(jnp.int32, (tn, cp), 1)
    # select + max instead of onehot float multiply: one fewer (TN,Cp) temp
    logit_tgt = jnp.max(jnp.where(class_ids == tgt_safe, logits, _NEG_INF),
                        axis=-1, keepdims=True)                    # (TN, 1)

    total = jnp.sum((lse - logit_tgt) * mask)                      # scalar f32
    denom = jnp.sum(mask)                                          # scalar f32

    # lane-dense (8,128) output block; only row 0 lanes 0/1 are read back.
    lane = lax.broadcasted_iota(jnp.int32, (_SUBLANE, _LANE), 1)
    o_ref[...] = jnp.where(lane == 0, total,
                           jnp.where(lane == 1, denom, 0.0))


def _fused_speech_loss(x_f32, w1, b1, w2, b2, targets, *, tile, vmem_limit):
    n_pad, d = x_f32.shape
    h_pad = w1.shape[1]
    c_pad = w2.shape[1]
    num_tiles = n_pad // tile

    flops = 2 * n_pad * d * h_pad + 2 * n_pad * h_pad * c_pad
    bytes_accessed = (n_pad * d * 4 + d * h_pad * 2 + h_pad * c_pad * 2
                      + (h_pad + c_pad) * 4 + n_pad * 4
                      + num_tiles * _SUBLANE * _LANE * 4)
    cost = pl.CostEstimate(flops=flops,
                           transcendentals=n_pad * (h_pad + c_pad),
                           bytes_accessed=bytes_accessed)

    def make_specs(single_buffer_weights):
        def resident(shape):
            if single_buffer_weights:
                # Grid-invariant operands: one VMEM copy instead of the default
                # double buffer (halves resident-weight VMEM; key on v7x).
                return pl.BlockSpec(shape, lambda i: (0, 0),
                                    pipeline_mode=pl.Buffered(1))
            return pl.BlockSpec(shape, lambda i: (0, 0))
        return [
            pl.BlockSpec((tile, d), lambda i: (i, 0)),     # x tile (f32, pipelined)
            resident((d, h_pad)),                          # W1
            resident((1, h_pad)),                          # b1
            resident((h_pad, c_pad)),                      # W2
            resident((1, c_pad)),                          # b2 (f32! -1e30 pad)
            pl.BlockSpec((tile, 1), lambda i: (i, 0)),     # targets tile
        ]

    def call(in_specs):
        return pl.pallas_call(
            _fused_speech_loss_kernel,
            out_shape=jax.ShapeDtypeStruct((num_tiles * _SUBLANE, _LANE),
                                           jnp.float32),
            grid=(num_tiles,),
            in_specs=in_specs,
            out_specs=pl.BlockSpec((_SUBLANE, _LANE), lambda i: (i, 0)),
            compiler_params=pltpu.CompilerParams(
                dimension_semantics=("parallel",),   # tiles fully independent
                vmem_limit_bytes=vmem_limit),
            cost_estimate=cost,
        )(x_f32, w1, b1, w2, b2, targets)

    try:
        partials = call(make_specs(True))
    except Exception:
        # Fallback for jax versions without BlockSpec.pipeline_mode / Buffered(1):
        # identical semantics, default double-buffered weights.
        partials = call(make_specs(False))

    # reduce per-tile partials and divide exactly once (correct under tiling)
    partials = partials.reshape(num_tiles, _SUBLANE, _LANE)
    total = jnp.sum(partials[:, 0, 0])
    denom = jnp.maximum(jnp.sum(partials[:, 0, 1]), 1.0)
    return total / denom


# ------------------------------ forward ------------------------------------ #

@functools.partial(jax.jit, static_argnames=("tile_n",))
def speech_model_forward(features, feature_lens, texts, text_lens, params,
                         tile_n=1024):
    """Reproduces SpeechModel.forward -> scalar training loss."""
    bs, t, f, c = features.shape
    n, d = bs * t, f * c
    h = params["w1"].shape[1]
    num_classes = params["w2"].shape[1]

    h_pad = _round_up(h, _LANE)
    c_pad = _round_up(num_classes, _LANE)

    vmem_limit = _vmem_limit_bytes()

    # ---- row-tile geometry: multiples of 8, capped by the per-generation VMEM
    # budget, and arranged so the "parallel" N axis has >= 2 (and an even number
    # of) tiles for v7x's two TensorCores.
    n8 = _round_up(n, _SUBLANE)
    tile = max(_SUBLANE, min(_round_up(int(tile_n), _SUBLANE), n8))
    tile = _cap_tile_for_vmem(tile, d, h_pad, c_pad, vmem_limit)
    if n8 >= 2 * _SUBLANE and tile > n8 // 2:
        tile = _round_up(pl.cdiv(n8, 2), _SUBLANE)
    n_pad = _round_up(n8, tile)
    num_tiles = n_pad // tile
    if num_tiles > 1 and num_tiles % 2 == 1:
        n_pad += tile          # one extra fully-masked tile -> balanced TC split
        num_tiles += 1

    # ---- encoder input: flatten (f, c) onto lanes. NO wrapper-side bf16 cast or
    # column padding: the kernel reads the f32 rows once and casts in-VMEM.
    x = features.reshape(n, d).astype(jnp.float32)
    if n_pad > n:
        x = jnp.pad(x, ((0, n_pad - n), (0, 0)))

    # ---- pad parameters once (zero padding is exact; padded classes -> -1e30)
    w1 = jnp.pad(params["w1"].astype(jnp.float32),
                 ((0, 0), (0, h_pad - h))).astype(jnp.bfloat16)
    b1 = jnp.pad(params["b1"].astype(jnp.float32), ((0, 0), (0, h_pad - h)))
    w2 = jnp.pad(params["w2"].astype(jnp.float32),
                 ((0, h_pad - h), (0, c_pad - num_classes))).astype(jnp.bfloat16)
    b2 = jnp.pad(params["b2"].astype(jnp.float32),
                 ((0, 0), (0, c_pad - num_classes)),
                 constant_values=_NEG_INF)   # must stay f32 (-1e30 not bf16-safe)

    # ---- glue: no time subsampling -> encoded_lens == feature_lens. Align each
    # valid frame linearly to a text token; invalid / padded frames and samples
    # with empty transcripts get -1 (masked out of the loss).
    encoded_lens = feature_lens.astype(jnp.int32)
    text_lens_i = text_lens.astype(jnp.int32)
    texts_i = texts.astype(jnp.int32)          # keep targets integer end-to-end

    frame_idx = jnp.arange(t, dtype=jnp.int32)                       # (t,)
    valid = ((frame_idx[None, :] < encoded_lens[:, None])
             & (text_lens_i[:, None] > 0))                           # (bs, t)
    tok_idx = (frame_idx[None, :] * text_lens_i[:, None]) // jnp.maximum(
        encoded_lens[:, None], 1)
    tok_idx = jnp.clip(tok_idx, 0, jnp.maximum(text_lens_i[:, None] - 1, 0))
    aligned = jnp.take_along_axis(texts_i, tok_idx, axis=1)          # (bs, t)
    targets = jnp.where(valid, aligned, -1).reshape(n, 1)
    if n_pad > n:
        targets = jnp.pad(targets, ((0, n_pad - n), (0, 0)), constant_values=-1)

    return _fused_speech_loss(x, w1, b1, w2, b2, targets,
                              tile=tile, vmem_limit=vmem_limit)


# -------------------------------- main -------------------------------------- #

if __name__ == "__main__":
    bs, t, f, c = 2, 16, 16, 4          # features: (bs x t x f x c)
    hidden = 32
    num_classes = 16
    l = 8                               # text length

    key = jax.random.PRNGKey(0)
    k_feat, k_txt, k_w1, k_b1, k_w2, k_b2 = jax.random.split(key, 6)

    features = jax.random.normal(k_feat, (bs, t, f, c), dtype=jnp.float32)
    feature_lens = jnp.array([t, t - 3], dtype=jnp.int32)
    texts = jax.random.randint(k_txt, (bs, l), 0, num_classes, dtype=jnp.int32)
    text_lens = jnp.array([l, l - 3], dtype=jnp.int32)

    d_in = f * c
    params = {
        "w1": (jax.random.normal(k_w1, (d_in, hidden), dtype=jnp.float32)
               * (1.0 / jnp.sqrt(d_in))),
        "b1": jax.random.normal(k_b1, (1, hidden), dtype=jnp.float32) * 0.01,
        "w2": (jax.random.normal(k_w2, (hidden, num_classes), dtype=jnp.float32)
               * (1.0 / jnp.sqrt(hidden))),
        "b2": jax.random.normal(k_b2, (1, num_classes), dtype=jnp.float32) * 0.01,
    }

    # tile_n=16 -> two N-tiles on this small example, exercising the tiled /
    # parallel partial-sum path; the default (1024, VMEM-capped) suits real sizes.
    loss = speech_model_forward(features, feature_lens, texts, text_lens,
                                params, tile_n=16)
    loss = jax.block_until_ready(loss)
    assert loss.shape == () and bool(jnp.isfinite(loss))
    print("KERNEL_OK")
</pallas_src>

<mosaic_0001>
module attributes {stable_mosaic.version = 11 : i64} {
  func.func @_fused_speech_loss_kernel(%arg0: i32, %arg1: memref<16x64xf32, #tpu.memory_space<vmem>>, %arg2: memref<64x128xbf16, #tpu.memory_space<vmem>>, %arg3: memref<1x128xf32, #tpu.memory_space<vmem>>, %arg4: memref<128x128xbf16, #tpu.memory_space<vmem>>, %arg5: memref<1x128xf32, #tpu.memory_space<vmem>>, %arg6: memref<16x1xi32, #tpu.memory_space<vmem>>, %arg7: memref<8x128xf32, #tpu.memory_space<vmem>>) attributes {dimension_semantics = [#tpu.dimension_semantics<parallel>], iteration_bounds = array<i64: 2>, scalar_prefetch = 0 : i64, scratch_operands = 0 : i64, tpu.core_type = #tpu.core_type<tc>, window_params = [{transform_indices = @transform_0, window_bounds = array<i64: 16, 64>}, {pipeline_mode = #tpu.pipeline_mode<synchronous>, transform_indices = @transform_1, window_bounds = array<i64: 64, 128>}, {pipeline_mode = #tpu.pipeline_mode<synchronous>, transform_indices = @transform_2, window_bounds = array<i64: 1, 128>}, {pipeline_mode = #tpu.pipeline_mode<synchronous>, transform_indices = @transform_3, window_bounds = array<i64: 128, 128>}, {pipeline_mode = #tpu.pipeline_mode<synchronous>, transform_indices = @transform_4, window_bounds = array<i64: 1, 128>}, {transform_indices = @transform_5, window_bounds = array<i64: 16, 1>}, {transform_indices = @transform_6, window_bounds = array<i64: 8, 128>}]} {
    %c0 = arith.constant 0 : index
    %c0_0 = arith.constant 0 : index
    %0 = vector.load %arg1[%c0, %c0_0] : memref<16x64xf32, #tpu.memory_space<vmem>>, vector<16x64xf32>
    %1 = arith.truncf %0 : vector<16x64xf32> to vector<16x64xbf16>
    %c0_1 = arith.constant 0 : index
    %c0_2 = arith.constant 0 : index
    %2 = vector.load %arg2[%c0_1, %c0_2] : memref<64x128xbf16, #tpu.memory_space<vmem>>, vector<64x128xbf16>
    %cst = arith.constant dense<0.000000e+00> : vector<16x128xf32>
    %3 = tpu.matmul %1, %2, %cst {dimension_numbers = #tpu.dot_dimension_numbers<[1], [0], [0], [1], [0, 0, 1, 1], [], []>} : vector<16x64xbf16>, vector<64x128xbf16>, vector<16x128xf32> -> vector<16x128xf32>
    %c0_3 = arith.constant 0 : index
    %c0_4 = arith.constant 0 : index
    %4 = vector.load %arg3[%c0_3, %c0_4] : memref<1x128xf32, #tpu.memory_space<vmem>>, vector<1x128xf32>
    %5 = vector.broadcast %4 : vector<1x128xf32> to vector<16x128xf32>
    %6 = arith.addf %3, %5 : vector<16x128xf32>
    %7 = math.tanh %6 : vector<16x128xf32>
    %8 = arith.truncf %7 : vector<16x128xf32> to vector<16x128xbf16>
    %c0_5 = arith.constant 0 : index
    %c0_6 = arith.constant 0 : index
    %9 = vector.load %arg4[%c0_5, %c0_6] : memref<128x128xbf16, #tpu.memory_space<vmem>>, vector<128x128xbf16>
    %cst_7 = arith.constant dense<0.000000e+00> : vector<16x128xf32>
    %10 = tpu.matmul %8, %9, %cst_7 {dimension_numbers = #tpu.dot_dimension_numbers<[1], [0], [0], [1], [0, 0, 1, 1], [], []>} : vector<16x128xbf16>, vector<128x128xbf16>, vector<16x128xf32> -> vector<16x128xf32>
    %c0_8 = arith.constant 0 : index
    %c0_9 = arith.constant 0 : index
    %11 = vector.load %arg5[%c0_8, %c0_9] : memref<1x128xf32, #tpu.memory_space<vmem>>, vector<1x128xf32>
    %12 = vector.broadcast %11 : vector<1x128xf32> to vector<16x128xf32>
    %13 = arith.addf %10, %12 : vector<16x128xf32>
    %cst_10 = arith.constant dense<0xFF800000> : vector<16xf32>
    %14 = vector.multi_reduction <maximumf>, %13, %cst_10 [1] : vector<16x128xf32> to vector<16xf32>
    %15 = vector.shape_cast %14 : vector<16xf32> to vector<16x1xf32>
    %16 = vector.broadcast %15 : vector<16x1xf32> to vector<16x128xf32>
    %17 = arith.subf %13, %16 : vector<16x128xf32>
    %18 = math.exp %17 : vector<16x128xf32>
    %cst_11 = arith.constant dense<0.000000e+00> : vector<16xf32>
    %19 = vector.multi_reduction <add>, %18, %cst_11 [1] : vector<16x128xf32> to vector<16xf32>
    %20 = vector.shape_cast %19 : vector<16xf32> to vector<16x1xf32>
    %21 = math.log %20 : vector<16x1xf32>
    %22 = arith.addf %15, %21 : vector<16x1xf32>
    %c0_12 = arith.constant 0 : index
    %c0_13 = arith.constant 0 : index
    %23 = vector.load %arg6[%c0_12, %c0_13] : memref<16x1xi32, #tpu.memory_space<vmem>>, vector<16x1xi32>
    %c0_i32 = arith.constant 0 : i32
    %24 = vector.broadcast %c0_i32 : i32 to vector<16x1xi32>
    %25 = arith.cmpi sge, %23, %24 : vector<16x1xi32>
    %26 = arith.extui %25 : vector<16x1xi1> to vector<16x1xi32>
    %27 = arith.sitofp %26 : vector<16x1xi32> to vector<16x1xf32>
    %c0_i32_14 = arith.constant 0 : i32
    %28 = vector.broadcast %c0_i32_14 : i32 to vector<16x1xi32>
    %29 = arith.maxsi %23, %28 : vector<16x1xi32>
    %30 = tpu.iota {dimensions = array<i32: 1>} : vector<16x128xi32>
    %31 = vector.broadcast %29 : vector<16x1xi32> to vector<16x128xi32>
    %32 = arith.cmpi eq, %30, %31 : vector<16x128xi32>
    %cst_15 = arith.constant -1.000000e+30 : f32
    %33 = vector.broadcast %cst_15 : f32 to vector<16x128xf32>
    %34 = arith.select %32, %13, %33 : vector<16x128xi1>, vector<16x128xf32>
    %cst_16 = arith.constant dense<0xFF800000> : vector<16xf32>
    %35 = vector.multi_reduction <maximumf>, %34, %cst_16 [1] : vector<16x128xf32> to vector<16xf32>
    %36 = vector.shape_cast %35 : vector<16xf32> to vector<16x1xf32>
    %37 = arith.subf %22, %36 : vector<16x1xf32>
    %38 = arith.mulf %37, %27 : vector<16x1xf32>
    %39 = vector.shape_cast %38 : vector<16x1xf32> to vector<1x16x1xf32>
    %cst_17 = arith.constant dense<0.000000e+00> : vector<1xf32>
    %40 = vector.multi_reduction <add>, %39, %cst_17 [1, 2] : vector<1x16x1xf32> to vector<1xf32>
    %41 = vector.shape_cast %40 : vector<1xf32> to vector<1x1x1xf32>
    %42 = vector.extract %41[0, 0, 0] : f32 from vector<1x1x1xf32>
    %43 = vector.shape_cast %27 : vector<16x1xf32> to vector<1x16x1xf32>
    %cst_18 = arith.constant dense<0.000000e+00> : vector<1xf32>
    %44 = vector.multi_reduction <add>, %43, %cst_18 [1, 2] : vector<1x16x1xf32> to vector<1xf32>
    %45 = vector.shape_cast %44 : vector<1xf32> to vector<1x1x1xf32>
    %46 = vector.extract %45[0, 0, 0] : f32 from vector<1x1x1xf32>
    %47 = tpu.iota {dimensions = array<i32: 1>} : vector<8x128xi32>
    %c0_i32_19 = arith.constant 0 : i32
    %48 = vector.broadcast %c0_i32_19 : i32 to vector<8x128xi32>
    %49 = arith.cmpi eq, %47, %48 : vector<8x128xi32>
    %c1_i32 = arith.constant 1 : i32
    %50 = vector.broadcast %c1_i32 : i32 to vector<8x128xi32>
    %51 = arith.cmpi eq, %47, %50 : vector<8x128xi32>
    %cst_20 = arith.constant 0.000000e+00 : f32
    %52 = vector.broadcast %46 : f32 to vector<8x128xf32>
    %53 = vector.broadcast %cst_20 : f32 to vector<8x128xf32>
    %54 = arith.select %51, %52, %53 : vector<8x128xi1>, vector<8x128xf32>
    %55 = vector.broadcast %42 : f32 to vector<8x128xf32>
    %56 = arith.select %49, %55, %54 : vector<8x128xi1>, vector<8x128xf32>
    %c0_21 = arith.constant 0 : index
    %c0_22 = arith.constant 0 : index
    %57 = vector.load %arg7[%c0_21, %c0_22] : memref<8x128xf32, #tpu.memory_space<vmem>>, vector<8x128xf32>
    tpu.vector_store %arg7[%c0_21, %c0_22], %56 {strides = array<i32>} : memref<8x128xf32, #tpu.memory_space<vmem>>, vector<8x128xf32>,
    return
  }
  func.func @transform_0(%arg0: i32) -> (i32, i32) {
    %c0_i32 = arith.constant 0 : i32
    %c0_i32_0 = arith.constant 0 : i32
    return %arg0, %c0_i32 : i32, i32
  }
  func.func @transform_1(%arg0: i32) -> (i32, i32) {
    %c0_i32 = arith.constant 0 : i32
    %c0_i32_0 = arith.constant 0 : i32
    %c0_i32_1 = arith.constant 0 : i32
    return %c0_i32, %c0_i32_0 : i32, i32
  }
  func.func @transform_2(%arg0: i32) -> (i32, i32) {
    %c0_i32 = arith.constant 0 : i32
    %c0_i32_0 = arith.constant 0 : i32
    %c0_i32_1 = arith.constant 0 : i32
    return %c0_i32, %c0_i32_0 : i32, i32
  }
  func.func @transform_3(%arg0: i32) -> (i32, i32) {
    %c0_i32 = arith.constant 0 : i32
    %c0_i32_0 = arith.constant 0 : i32
    %c0_i32_1 = arith.constant 0 : i32
    return %c0_i32, %c0_i32_0 : i32, i32
  }
  func.func @transform_4(%arg0: i32) -> (i32, i32) {
    %c0_i32 = arith.constant 0 : i32
    %c0_i32_0 = arith.constant 0 : i32
    %c0_i32_1 = arith.constant 0 : i32
    return %c0_i32, %c0_i32_0 : i32, i32
  }
  func.func @transform_5(%arg0: i32) -> (i32, i32) {
    %c0_i32 = arith.constant 0 : i32
    %c0_i32_0 = arith.constant 0 : i32
    return %arg0, %c0_i32 : i32, i32
  }
  func.func @transform_6(%arg0: i32) -> (i32, i32) {
    %c0_i32 = arith.constant 0 : i32
    %c0_i32_0 = arith.constant 0 : i32
    return %arg0, %c0_i32 : i32, i32
  }
}

</mosaic_0001>

<bundles_post_ra>
// kernel: speech_model_forward.1
= control target key start
LH: loop header
LB: loop body
LE: loop exit
PB: predicated region body
PF: predicated region fallthrough
CT: control target
= control target key end

     0   :  { %s716_s21 = smov 0   ;;  %s796_s0 = inlined_call_operand.vmem [shape: f32[32,64], index: 0, kind: input, shape index: {}]   ;;  %s797_s1 = inlined_call_operand.vmem [shape: bf16[64,128], index: 1, kind: input, shape index: {}]   ;;  %s798_s2 = inlined_call_operand.vmem [shape: f32[1,128], index: 2, kind: input, shape index: {}]   ;;  %s799_s3 = inlined_call_operand.vmem [shape: bf16[128,128], index: 3, kind: input, shape index: {}]   ;;  %s800_s4 = inlined_call_operand.vmem [shape: f32[1,128], index: 4, kind: input, shape index: {}]   ;;  %s801_s5 = inlined_call_operand.vmem [shape: s32[32,1], index: 5, kind: input, shape index: {}]   ;;  %s802_s6 = inlined_call_operand.vmem [shape: f32[16,128], index: 6, kind: output, shape index: {}]  }
   0x1 LB: > { %s722_s22 = sadd.s32 4294967295, %s677_s21   ;;  %p570_p0 = scmp.ge.s32.totalorder %s677_s21, 1  ;;  %s677_s21 = sphi %s716_s21, %s16_s21  }
   0x2   : > { %p224_p1 = scmp.lt.s32.totalorder %s677_s21, 3 }
   0x4   : > { %p225_p2 = pnand %p570_p0, %p224_p1 }
   0x5   : > { %s571_s25 = sshll.u32 (!%p225_p2), %s722_s22, 1  ;;  %p270_p4 = scmp.lt.s32.totalorder (!%p225_p2), %s722_s22, 1 }
   0x6   : > { %228 = sbr.rel (%p225_p2) target bundleno = 752 (0x2f0), region = 44  ;;  %p259_p3 = scmp.lt.s32.totalorder (!%p225_p2), %s571_s25, 3 }
   0xb   : > { %v632_v0 = vld [vmem:[%s797_s1 + $0x18] sm:$0xff]  ;;  %v631_v2 = vld [vmem:[%s797_s1 + $0x10] sm:$0xff]  ;;  %s804_s25 = smov (!%p259_p3, %s571_s25), 3  ;;  %v630_v4 = vld [vmem:[%s797_s1 + $0x8] sm:$0xff]  ;;  %vm314_vm0 = vcmask 523264   ;;  %v679_v16 = vmov 0   ;;  %v449_v32 = vlaneseq }
   0xc   : > { %v640_v1 = vld [vmem:[%s799_s3 + $0x38] sm:$0xff]  ;;  %322 = vmatpush.bf16.msra.mxu0 %v632_v0  ;;  %v639_v3 = vld [vmem:[%s799_s3 + $0x30] sm:$0xff]  ;;  %s572_s8 = sshll.u32 %s804_s25, 3  ;;  %v638_v5 = vld [vmem:[%s799_s3 + $0x28] sm:$0xff]  ;;  %655 = vset.pattern.permute.xlu1 %v679_v16  ;;  %v680_v47 = vmov 0.0   ;;  %vm469_vm7 = vcmask 7168  }
   0xd   : > { %403 = vmatpush.bf16.msra.mxu1 %v640_v1  ;;  %s262_s13 = scalar_lea.vmem %s796_s0, %s572_s8  ;;  %v629_v6 = vld [vmem:[%s797_s1] sm:$0xff]  ;;  %v636_v11 = vld [vmem:[%s799_s3 + $0x18] sm:$0xff]  ;;  %v635_v12 = vld [vmem:[%s799_s3 + $0x10] sm:$0xff]  ;;  %s268_s9 = scalar_lea.vmem %s801_s5, %s572_s8  ;;  %656 = vset.pattern.permute.xlu0 %v679_v16  ;;  %v778_v34 = vand.u32 127, %v449_v32 }
   0xe   : > { %v275_v7 = vld [vmem:[%s262_s13] sm:$0xff]  ;;  %v276_v8 = vld [vmem:[%s262_s13 + $0x8] sm:$0xff]  ;;  %s806_s22 = smov (!%p270_p4, %s722_s22), 1 }
   0xf   : > { %v277_v9 = vpack.c.bf16 %v276_v8, %v275_v7  ;;  %v637_v10 = vld [vmem:[%s799_s3 + $0x20] sm:$0xff]  ;;  %v634_v13 = vld [vmem:[%s799_s3 + $0x8] sm:$0xff]  ;;  %s575_s13 = sshll.u32 %s806_s22, 3  ;;  %vm495_vm8 = vcmp.eq.s32.totalorder %v778_v34, 1  ;;  %vm494_vm9 = vcmp.eq.s32.totalorder %v778_v34, 0 }
  0x10   : > { %323 = vmatpush.bf16.msra.mxu0 %v631_v2  ;;  %v633_v14 = vld [vmem:[%s799_s3] sm:$0xff]  ;;  %v438_v18 = vld [vmem:[%s268_s9 + $0x8] sm:$0xff]  ;;  %s273_s18 = scalar_lea.vmem %s802_s6, %s575_s13 }
  0x11   : > { %404 = vmatpush.bf16.msra.mxu1 %v639_v3  ;;  %v437_v15 = vld [vmem:[%s268_s9] sm:$0xff]  ;;  %vm447_vm2 = vcmp.gt.s32.totalorder %v438_v18, 0  ;;  %vm440_vm6 = vcmp.ge.s32.totalorder %v438_v18, 0 }
  0x12   : > { %vm445_vm1 = vcmp.gt.s32.totalorder %v437_v15, 0  ;;  %v448_v19 = vsel %vm447_vm2, %v438_v18, 0  ;;  %v657_v21 = vld [vmem:[%s798_s2] ss:$0 sm:$0xff]  ;;  %vm439_vm5 = vcmp.ge.s32.totalorder %v437_v15, 0  ;;  %v626_v49 = vsel %vm440_vm6, 1.0, %v680_v47 }
  0x13   : > { %v446_v17 = vsel %vm445_vm1, %v437_v15, 0  ;;  %v658_v29 = vld [vmem:[%s800_s4] ss:$0 sm:$0xff]  ;;  %v625_v48 = vsel %vm439_vm5, 1.0, %v680_v47  ;;  %v483_v51 = vsel %vm469_vm7, %v626_v49, 0.0 }
  0x14   : > { %324 = vmatpush.bf16.msra.mxu0 %v630_v4  ;;  %452 = vperm.xlu1 %655, %v446_v17   ;;  %v482_v50 = vsel %vm469_vm7, %v625_v48, 0.0 }
  0x15   : > { %405 = vmatpush.bf16.msra.mxu1 %v638_v5  ;;  %v484_v52 = vadd.f32 %v483_v51, %v482_v50 }
  0x18   : > { %325 = vmatpush.bf16.msra.mxu0 %v629_v6 }
  0x19   : > { %406 = vmatpush.bf16.msra.mxu1 %v637_v10 }
  0x1b   : > { %592 = vmatmul.msk.bf16.vlgmr.msra.gmra.mxu0 %vm314_vm0, %v277_v9 }
  0x1c   : > { %455 = vperm.xlu1 %655, %v448_v19  }
  0x1d   : > { %407 = vmatpush.bf16.msra.mxu1 %v636_v11 }
  0x21   : > { %408 = vmatpush.bf16.msra.mxu1 %v635_v12 }
  0x25   : > { %409 = vmatpush.bf16.msra.mxu1 %v634_v13 }
  0x29   : > { %410 = vmatpush.bf16.msra.mxu1 %v633_v14 }
  0x86   : > { %v453_v28 = vpop.permute.xlu1 %452 }
  0x87   : > { %vm457_vm4 = vcmp.eq.s32.totalorder %v778_v34, %v453_v28 }
  0x8e   : > { %v456_v33 = vpop.permute.xlu1 %455 }
  0x8f   : > { %vm458_vm3 = vcmp.eq.s32.totalorder %v778_v34, %v456_v33 }
  0x98   : > { %v327_v20 = vpop.f32.mrf.mxu0 }
  0x99   : > { %v328_v22 = vadd.f32 %v657_v21, %v327_v20 }
  0x9b   : > { %659 = vtanh.f32 %v328_v22 }
  0xa0   : > { %v329_v23 = vpop.f32.mrf.mxu0 }
  0xa1   : > { %v330_v24 = vadd.f32 %v657_v21, %v329_v23  ;;  %v660_v25 = vpop.eup %659 }
  0xa3   : > { %661 = vtanh.f32 %v330_v24 }
  0xa9   : > { %v662_v26 = vpop.eup %661 }
  0xaa   : > { %v334_v27 = vpack.c.bf16 %v662_v26, %v660_v25 }
  0xac   : > { %411 = vmatmul.bf16.vlgmr.msra.gmra.mxu1 %v334_v27 }
 0x129   : > { %v412_v30 = vpop.f32.mrf.mxu1 }
 0x12a   : > { %v413_v31 = vadd.f32 %v658_v29, %v412_v30 }
 0x12c   : > { %417 = vmax.xlane.f32.xlu0 %v413_v31  ;;  %v459_v38 = vsel %vm457_vm4, %v413_v31, -1e+30 }
 0x131   : > { %v414_v35 = vpop.f32.mrf.mxu1 }
 0x132   : > { %v415_v36 = vadd.f32 %v658_v29, %v414_v35 }
 0x134   : > { %419 = vmax.xlane.f32.xlu0 %v415_v36  ;;  %v460_v37 = vsel %vm458_vm3, %v415_v36, -1e+30 }
 0x135   : > { %463 = vmax.xlane.f32.xlu1 %v460_v37 }
 0x13c   : > { %461 = vmax.xlane.f32.xlu0 %v459_v38 }
 0x144   : > { %485 = vadd.xlane.f32.xlu0 %v484_v52 }
 0x19f   : > { %v418_v39 = vpop.xlane.xlu0 %417 }
 0x1a0   : > { %v421_v40 = vsub.f32 %v413_v31, %v418_v39 }
 0x1a2   : > { %v423_v41 = vmul.f32 1.442695, %v421_v40 }
 0x1a4   : > { %663 = vpow2.f32 %v423_v41 }
 0x1a7   : > { %v420_v42 = vpop.xlane.xlu0 %419 }
 0x1a8   : > { %v422_v43 = vsub.f32 %v415_v36, %v420_v42  ;;  %v464_v63 = vpop.xlane.xlu1 %463 }
 0x1aa   : > { %v664_v44 = vpop.eup %663  ;;  %v425_v45 = vmul.f32 1.442695, %v422_v43 }
 0x1ab   : > { %427 = vadd.xlane.f32.xlu2 %v664_v44 }
 0x1ac   : > { %665 = vpow2.f32 %v425_v45 }
 0x1af   : > { %v462_v59 = vpop.xlane.xlu0 %461 }
 0x1b2   : > { %v666_v46 = vpop.eup %665 }
 0x1b3   : > { %429 = vadd.xlane.f32.xlu2 %v666_v46 }
 0x1b7   : > { %v486_v6 = vpop.xlane.xlu0 %485 }
 0x1b8   : > { %v487_v7 = vrot.slane %v486_v6, 4 }
 0x1ba   : > { %v488_v8 = vadd.f32 %v487_v7, %v486_v6 }
 0x1bc   : > { %v489_v9 = vrot.slane %v488_v8, 2 }
 0x1be   : > { %v490_v13 = vadd.f32 %v489_v9, %v488_v8 }
 0x1c0   : > { %v491_v16 = vrot.slane %v490_v13, 1 }
 0x1c2   : > { %v492_v19 = vadd.f32 %v491_v16, %v490_v13 }
 0x21e   : > { %v428_v53 = vpop.xlane.xlu2 %427 }
 0x21f   : > { %667 = vlog2.f32 %v428_v53 }
 0x225   : > { %v668_v54 = vpop.eup %667 }
 0x226   : > { %v432_v55 = vmul.f32 0.6931472, %v668_v54  ;;  %v430_v56 = vpop.xlane.xlu2 %429 }
 0x227   : > { %669 = vlog2.f32 %v430_v56 }
 0x228   : > { %v435_v57 = vadd.f32 %v432_v55, %v418_v39 }
 0x22a   : > { %v465_v60 = vsub.f32 %v435_v57, %v462_v59 }
 0x22c   : > { %v467_v1 = vmul.f32 %v625_v48, %v465_v60 }
 0x22d   : > { %v670_v58 = vpop.eup %669 }
 0x22e   : > { %v434_v61 = vmul.f32 0.6931472, %v670_v58  ;;  %v470_v3 = vsel %vm469_vm7, %v467_v1, 0.0 }
 0x230   : > { %v436_v62 = vadd.f32 %v434_v61, %v420_v42 }
 0x232   : > { %v466_v0 = vsub.f32 %v436_v62, %v464_v63 }
 0x234   : > { %v468_v2 = vmul.f32 %v626_v49, %v466_v0 }
 0x236   : > { %v471_v4 = vsel %vm469_vm7, %v468_v2, 0.0 }
 0x237   : > { %v472_v5 = vadd.f32 %v471_v4, %v470_v3 }
 0x239   : > { %473 = vadd.xlane.f32.xlu2 %v472_v5 }
 0x2ac   : > { %v474_v10 = vpop.xlane.xlu2 %473 }
 0x2ad   : > { %v475_v11 = vrot.slane %v474_v10, 4 }
 0x2af   : > { %v476_v12 = vadd.f32 %v475_v11, %v474_v10 }
 0x2b1   : > { %v477_v14 = vrot.slane %v476_v12, 2 }
 0x2b3   : > { %v478_v15 = vadd.f32 %v477_v14, %v476_v12 }
 0x2b5   : > { %v479_v17 = vrot.slane %v478_v15, 1 }
 0x2b7   : > { %v480_v18 = vadd.f32 %v479_v17, %v478_v15 }
 0x2b9   : > { %641 = vpush %v480_v18 }
 0x2ba   : > { %643 = vpush %v492_v19 }
 0x2ea   : > { %s642_s14 = spop %641 }
 0x2eb   : > { %v498_v20 = vstv %s642_s14  ;;  %s644_s15 = spop %643 }
 0x2ec   : > { %v496_v21 = vstv %s644_s15 }
 0x2ed   : > { %v497_v22 = vsel %vm495_vm8, %v496_v21, 0.0 }
 0x2ee   : > { %v499_v23 = vsel %vm494_vm9, %v498_v20, %v497_v22 }
 0x2ef   : > { %500 = vst [vmem:[%s273_s18] sm:$0xff] %v499_v23 }
 0x2f0 PF: > { %s16_s21 = sadd.s32 1, %s677_s21  }
 0x2f1   : > { %p13_p5 = scmp.ge.s32.totalorder %s16_s21, 4  }
 0x2f3   :  { %15 = sbr.rel (!%p13_p5) target bundleno = 1 (0x1), region = 77 }

</bundles_post_ra>
